<compile_context>
chip_gen: v6e
topology: v6e:2x2x1
jax: 0.10.0
libtpu: 0.0.40
codegen_flags: <defaults>
</compile_context>

<pallas_src>
import functools

import jax
import jax.numpy as jnp
from jax.experimental import pallas as pl
from jax.experimental.pallas import tpu as pltpu

NEG_INF = -1e30  # bias value for padded action columns (exp underflows to 0)


def actor_mlp_kernel(x_ref, w1_ref, b1_ref, w2_ref, b2_ref, w3_ref, b3_ref,
                     probs_ref):
    """One batch tile of the 3-layer actor MLP + softmax.

    Weights arrive in their storage dtype (bf16 by default) and stay
    VMEM-resident across grid steps.  Only the MXU operands are cast to the
    weight dtype; bias-add / ReLU / softmax are computed in f32.
    """
    wdt = w1_ref.dtype
    x = x_ref[...]

    # Layer 1: Linear + ReLU (MXU, f32 accumulate)
    h1 = jnp.dot(x.astype(wdt), w1_ref[...], preferred_element_type=jnp.float32)
    h1 = jnp.maximum(h1 + b1_ref[...], 0.0)

    # Layer 2: Linear + ReLU
    h2 = jnp.dot(h1.astype(wdt), w2_ref[...], preferred_element_type=jnp.float32)
    h2 = jnp.maximum(h2 + b2_ref[...], 0.0)

    # Layer 3: Linear -> logits (padded action columns get NEG_INF via b3)
    logits = jnp.dot(h2.astype(wdt), w3_ref[...],
                     preferred_element_type=jnp.float32)
    logits = logits + b3_ref[...]

    # Numerically stable softmax over the (lane-dense, 128-wide) last dim.
    m = jnp.max(logits, axis=-1, keepdims=True)
    e = jnp.exp(logits - m)                      # padded columns -> 0
    denom = jnp.sum(e, axis=-1, keepdims=True)
    probs_ref[...] = (e * pl.reciprocal(denom, approx=True)).astype(
        probs_ref.dtype)


def prepare_params(params, *, lane_pad=128, weight_dtype=jnp.bfloat16):
    """Pad the action (lane) dim of layer 3 to a multiple of `lane_pad` and
    cast matmul weights to `weight_dtype`.  Biases stay f32 (elementwise)."""
    w3, b3 = params["w3"], params["b3"]
    l2, n_actions = w3.shape
    a_pad = ((n_actions + lane_pad - 1) // lane_pad) * lane_pad
    w3p = jnp.zeros((l2, a_pad), jnp.float32).at[:, :n_actions].set(w3)
    b3p = jnp.full((1, a_pad), NEG_INF, jnp.float32).at[:, :n_actions].set(
        b3.reshape(1, -1))
    return {
        "w1": params["w1"].astype(weight_dtype),
        "b1": params["b1"].reshape(1, -1).astype(jnp.float32),
        "w2": params["w2"].astype(weight_dtype),
        "b2": params["b2"].reshape(1, -1).astype(jnp.float32),
        "w3": w3p.astype(weight_dtype),
        "b3": b3p,
    }


@functools.partial(jax.jit, static_argnames=("n_actions", "block_b"))
def actor_forward(state, prepared, *, n_actions, block_b=128):
    """state: (B, D) f32.  prepared: output of prepare_params.
    Returns (B, n_actions) softmax probabilities (the Categorical's probs)."""
    B, D = state.shape
    L1 = prepared["w1"].shape[1]
    L2 = prepared["w2"].shape[1]
    A = prepared["w3"].shape[1]          # lane-padded action dim (>= 128)

    # Pad the batch to a multiple of the tile so the grid is exact.
    tb = block_b
    Bp = tb * pl.cdiv(B, tb)
    if Bp != B:
        state = jnp.pad(state, ((0, Bp - B), (0, 0)))

    def wspec(shape):                     # weight-stationary across the grid
        return pl.BlockSpec(shape, lambda i: (0, 0))

    weight_bytes = sum(
        int(prepared[k].size) * prepared[k].dtype.itemsize
        for k in ("w1", "b1", "w2", "b2", "w3", "b3"))
    cost = pl.CostEstimate(
        flops=2 * Bp * (D * L1 + L1 * L2 + L2 * A),
        transcendentals=Bp * (A + 1),
        bytes_accessed=weight_bytes + Bp * (D + A) * 4,
    )

    probs_padded = pl.pallas_call(
        actor_mlp_kernel,
        out_shape=jax.ShapeDtypeStruct((Bp, A), jnp.float32),
        grid=(Bp // tb,),
        in_specs=[
            pl.BlockSpec((tb, D), lambda i: (i, 0)),   # activation stream
            wspec((D, L1)), wspec((1, L1)),
            wspec((L1, L2)), wspec((1, L2)),
            wspec((L2, A)), wspec((1, A)),
        ],
        out_specs=pl.BlockSpec((tb, A), lambda i: (i, 0)),
        compiler_params=pltpu.CompilerParams(
            dimension_semantics=("parallel",)),
        cost_estimate=cost,
    )(state, prepared["w1"], prepared["b1"], prepared["w2"], prepared["b2"],
      prepared["w3"], prepared["b3"])

    return probs_padded[:B, :n_actions]


def init_params(key, in_dim, l1, l2, n_actions):
    """PyTorch-style Linear init: U(-1/sqrt(fan_in), 1/sqrt(fan_in)).
    Weights stored as (in_features, out_features); biases as (1, out)."""
    ks = jax.random.split(key, 6)

    def lin(kw, kb, fan_in, fan_out):
        bound = 1.0 / jnp.sqrt(jnp.float32(fan_in))
        w = jax.random.uniform(kw, (fan_in, fan_out), jnp.float32, -bound, bound)
        b = jax.random.uniform(kb, (1, fan_out), jnp.float32, -bound, bound)
        return w, b

    w1, b1 = lin(ks[0], ks[1], in_dim, l1)
    w2, b2 = lin(ks[2], ks[3], l1, l2)
    w3, b3 = lin(ks[4], ks[5], l2, n_actions)
    return {"w1": w1, "b1": b1, "w2": w2, "b2": b2, "w3": w3, "b3": b3}


if __name__ == "__main__":
    # Small shapes consistent with the module:
    #   input_dims = (4, 4, 4) -> D = 64, Layer1 = 128, Layer2 = 256,
    #   n_actions = 8, batch = 256 (two 128-row grid tiles).
    key = jax.random.PRNGKey(0)
    k_state, k_param = jax.random.split(key)

    batch = 256
    input_dims = (4, 4, 4)
    D = input_dims[0] * input_dims[1] * input_dims[2]
    L1, L2, n_actions = 128, 256, 8

    state = jax.random.normal(k_state, (batch, D), dtype=jnp.float32)
    params = init_params(k_param, D, L1, L2, n_actions)
    prepared = prepare_params(params)

    probs = actor_forward(state, prepared, n_actions=n_actions, block_b=128)
    probs = jax.block_until_ready(probs)

    # Reference A: same bf16-matmul / f32-elementwise math in plain JAX.
    def ref_bf16(x, p):
        bf = jnp.bfloat16
        h1 = jnp.maximum(
            jnp.dot(x.astype(bf), p["w1"].astype(bf),
                    preferred_element_type=jnp.float32) + p["b1"], 0.0)
        h2 = jnp.maximum(
            jnp.dot(h1.astype(bf), p["w2"].astype(bf),
                    preferred_element_type=jnp.float32) + p["b2"], 0.0)
        logits = jnp.dot(h2.astype(bf), p["w3"].astype(bf),
                         preferred_element_type=jnp.float32) + p["b3"]
        return jax.nn.softmax(logits, axis=-1)

    # Reference B: pure f32 (matches the PyTorch module exactly).
    def ref_f32(x, p):
        h1 = jnp.maximum(x @ p["w1"] + p["b1"], 0.0)
        h2 = jnp.maximum(h1 @ p["w2"] + p["b2"], 0.0)
        return jax.nn.softmax(h2 @ p["w3"] + p["b3"], axis=-1)

    expected_bf16 = ref_bf16(state, params)
    expected_f32 = ref_f32(state, params)

    assert probs.shape == (batch, n_actions)
    assert jnp.allclose(jnp.sum(probs, axis=-1), 1.0, atol=2e-2)
    assert jnp.allclose(probs, expected_bf16, atol=1e-2, rtol=1e-2)
    assert jnp.allclose(probs, expected_f32, atol=5e-2)

    # TODO(synk): Categorical sampling / log_prob and the Adam optimizer are
    # host/JAX-side concerns; the kernel returns probs, which fully define
    # the Categorical distribution.
    print("KERNEL_OK")
</pallas_src>

<mosaic_0001>
module attributes {stable_mosaic.version = 11 : i64} {
  func.func @actor_mlp_kernel(%arg0: i32, %arg1: memref<128x64xf32, #tpu.memory_space<vmem>>, %arg2: memref<64x128xbf16, #tpu.memory_space<vmem>>, %arg3: memref<1x128xf32, #tpu.memory_space<vmem>>, %arg4: memref<128x256xbf16, #tpu.memory_space<vmem>>, %arg5: memref<1x256xf32, #tpu.memory_space<vmem>>, %arg6: memref<256x128xbf16, #tpu.memory_space<vmem>>, %arg7: memref<1x128xf32, #tpu.memory_space<vmem>>, %arg8: memref<128x128xf32, #tpu.memory_space<vmem>>) attributes {dimension_semantics = [#tpu.dimension_semantics<parallel>], iteration_bounds = array<i64: 2>, scalar_prefetch = 0 : i64, scratch_operands = 0 : i64, tpu.core_type = #tpu.core_type<tc>, window_params = [{transform_indices = @transform_0, window_bounds = array<i64: 128, 64>}, {pipeline_mode = #tpu.pipeline_mode<synchronous>, transform_indices = @transform_1, window_bounds = array<i64: 64, 128>}, {pipeline_mode = #tpu.pipeline_mode<synchronous>, transform_indices = @transform_2, window_bounds = array<i64: 1, 128>}, {pipeline_mode = #tpu.pipeline_mode<synchronous>, transform_indices = @transform_3, window_bounds = array<i64: 128, 256>}, {pipeline_mode = #tpu.pipeline_mode<synchronous>, transform_indices = @transform_4, window_bounds = array<i64: 1, 256>}, {pipeline_mode = #tpu.pipeline_mode<synchronous>, transform_indices = @transform_5, window_bounds = array<i64: 256, 128>}, {pipeline_mode = #tpu.pipeline_mode<synchronous>, transform_indices = @transform_6, window_bounds = array<i64: 1, 128>}, {transform_indices = @transform_7, window_bounds = array<i64: 128, 128>}]} {
    %c0 = arith.constant 0 : index
    %c0_0 = arith.constant 0 : index
    %0 = vector.load %arg1[%c0, %c0_0] : memref<128x64xf32, #tpu.memory_space<vmem>>, vector<128x64xf32>
    %1 = arith.truncf %0 : vector<128x64xf32> to vector<128x64xbf16>
    %c0_1 = arith.constant 0 : index
    %c0_2 = arith.constant 0 : index
    %2 = vector.load %arg2[%c0_1, %c0_2] : memref<64x128xbf16, #tpu.memory_space<vmem>>, vector<64x128xbf16>
    %cst = arith.constant dense<0.000000e+00> : vector<128x128xf32>
    %3 = tpu.matmul %1, %2, %cst {dimension_numbers = #tpu.dot_dimension_numbers<[1], [0], [0], [1], [0, 0, 1, 1], [], []>} : vector<128x64xbf16>, vector<64x128xbf16>, vector<128x128xf32> -> vector<128x128xf32>
    %c0_3 = arith.constant 0 : index
    %c0_4 = arith.constant 0 : index
    %4 = vector.load %arg3[%c0_3, %c0_4] : memref<1x128xf32, #tpu.memory_space<vmem>>, vector<1x128xf32>
    %5 = vector.broadcast %4 : vector<1x128xf32> to vector<128x128xf32>
    %6 = arith.addf %3, %5 : vector<128x128xf32>
    %cst_5 = arith.constant 0.000000e+00 : f32
    %7 = vector.broadcast %cst_5 : f32 to vector<128x128xf32>
    %8 = arith.maximumf %6, %7 : vector<128x128xf32>
    %9 = arith.truncf %8 : vector<128x128xf32> to vector<128x128xbf16>
    %c0_6 = arith.constant 0 : index
    %c0_7 = arith.constant 0 : index
    %10 = vector.load %arg4[%c0_6, %c0_7] : memref<128x256xbf16, #tpu.memory_space<vmem>>, vector<128x256xbf16>
    %cst_8 = arith.constant dense<0.000000e+00> : vector<128x256xf32>
    %11 = tpu.matmul %9, %10, %cst_8 {dimension_numbers = #tpu.dot_dimension_numbers<[1], [0], [0], [1], [0, 0, 1, 1], [], []>} : vector<128x128xbf16>, vector<128x256xbf16>, vector<128x256xf32> -> vector<128x256xf32>
    %c0_9 = arith.constant 0 : index
    %c0_10 = arith.constant 0 : index
    %12 = vector.load %arg5[%c0_9, %c0_10] : memref<1x256xf32, #tpu.memory_space<vmem>>, vector<1x256xf32>
    %13 = vector.broadcast %12 : vector<1x256xf32> to vector<128x256xf32>
    %14 = arith.addf %11, %13 : vector<128x256xf32>
    %cst_11 = arith.constant 0.000000e+00 : f32
    %15 = vector.broadcast %cst_11 : f32 to vector<128x256xf32>
    %16 = arith.maximumf %14, %15 : vector<128x256xf32>
    %17 = arith.truncf %16 : vector<128x256xf32> to vector<128x256xbf16>
    %c0_12 = arith.constant 0 : index
    %c0_13 = arith.constant 0 : index
    %18 = vector.load %arg6[%c0_12, %c0_13] : memref<256x128xbf16, #tpu.memory_space<vmem>>, vector<256x128xbf16>
    %cst_14 = arith.constant dense<0.000000e+00> : vector<128x128xf32>
    %19 = tpu.matmul %17, %18, %cst_14 {dimension_numbers = #tpu.dot_dimension_numbers<[1], [0], [0], [1], [0, 0, 1, 1], [], []>} : vector<128x256xbf16>, vector<256x128xbf16>, vector<128x128xf32> -> vector<128x128xf32>
    %c0_15 = arith.constant 0 : index
    %c0_16 = arith.constant 0 : index
    %20 = vector.load %arg7[%c0_15, %c0_16] : memref<1x128xf32, #tpu.memory_space<vmem>>, vector<1x128xf32>
    %21 = vector.broadcast %20 : vector<1x128xf32> to vector<128x128xf32>
    %22 = arith.addf %19, %21 : vector<128x128xf32>
    %cst_17 = arith.constant dense<0xFF800000> : vector<128xf32>
    %23 = vector.multi_reduction <maximumf>, %22, %cst_17 [1] : vector<128x128xf32> to vector<128xf32>
    %24 = vector.shape_cast %23 : vector<128xf32> to vector<128x1xf32>
    %25 = vector.broadcast %24 : vector<128x1xf32> to vector<128x128xf32>
    %26 = arith.subf %22, %25 : vector<128x128xf32>
    %27 = math.exp %26 : vector<128x128xf32>
    %cst_18 = arith.constant dense<0.000000e+00> : vector<128xf32>
    %28 = vector.multi_reduction <add>, %27, %cst_18 [1] : vector<128x128xf32> to vector<128xf32>
    %29 = vector.shape_cast %28 : vector<128xf32> to vector<128x1xf32>
    %30 = tpu.reciprocal %29 {approx = true} : vector<128x1xf32> -> vector<128x1xf32>
    %31 = vector.broadcast %30 : vector<128x1xf32> to vector<128x128xf32>
    %32 = arith.mulf %27, %31 : vector<128x128xf32>
    %c0_19 = arith.constant 0 : index
    %c0_20 = arith.constant 0 : index
    %33 = vector.load %arg8[%c0_19, %c0_20] : memref<128x128xf32, #tpu.memory_space<vmem>>, vector<128x128xf32>
    tpu.vector_store %arg8[%c0_19, %c0_20], %32 {strides = array<i32>} : memref<128x128xf32, #tpu.memory_space<vmem>>, vector<128x128xf32>,
    return
  }
  func.func @transform_0(%arg0: i32) -> (i32, i32) {
    %c0_i32 = arith.constant 0 : i32
    %c0_i32_0 = arith.constant 0 : i32
    return %arg0, %c0_i32 : i32, i32
  }
  func.func @transform_1(%arg0: i32) -> (i32, i32) {
    %c0_i32 = arith.constant 0 : i32
    %c0_i32_0 = arith.constant 0 : i32
    %c0_i32_1 = arith.constant 0 : i32
    return %c0_i32, %c0_i32_0 : i32, i32
  }
  func.func @transform_2(%arg0: i32) -> (i32, i32) {
    %c0_i32 = arith.constant 0 : i32
    %c0_i32_0 = arith.constant 0 : i32
    %c0_i32_1 = arith.constant 0 : i32
    return %c0_i32, %c0_i32_0 : i32, i32
  }
  func.func @transform_3(%arg0: i32) -> (i32, i32) {
    %c0_i32 = arith.constant 0 : i32
    %c0_i32_0 = arith.constant 0 : i32
    %c0_i32_1 = arith.constant 0 : i32
    return %c0_i32, %c0_i32_0 : i32, i32
  }
  func.func @transform_4(%arg0: i32) -> (i32, i32) {
    %c0_i32 = arith.constant 0 : i32
    %c0_i32_0 = arith.constant 0 : i32
    %c0_i32_1 = arith.constant 0 : i32
    return %c0_i32, %c0_i32_0 : i32, i32
  }
  func.func @transform_5(%arg0: i32) -> (i32, i32) {
    %c0_i32 = arith.constant 0 : i32
    %c0_i32_0 = arith.constant 0 : i32
    %c0_i32_1 = arith.constant 0 : i32
    return %c0_i32, %c0_i32_0 : i32, i32
  }
  func.func @transform_6(%arg0: i32) -> (i32, i32) {
    %c0_i32 = arith.constant 0 : i32
    %c0_i32_0 = arith.constant 0 : i32
    %c0_i32_1 = arith.constant 0 : i32
    return %c0_i32, %c0_i32_0 : i32, i32
  }
  func.func @transform_7(%arg0: i32) -> (i32, i32) {
    %c0_i32 = arith.constant 0 : i32
    %c0_i32_0 = arith.constant 0 : i32
    return %arg0, %c0_i32 : i32, i32
  }
}

</mosaic_0001>

<bundles_post_ra>
// kernel: actor_forward.1
= control target key start
LH: loop header
LB: loop body
LE: loop exit
PB: predicated region body
PF: predicated region fallthrough
CT: control target
= control target key end

     0   :  { %s1548_s24 = smov 0   ;;  %s1941_s0 = inlined_call_operand.vmem [shape: f32[256,64], index: 0, kind: input, shape index: {}]   ;;  %s1942_s1 = inlined_call_operand.vmem [shape: bf16[64,128], index: 1, kind: input, shape index: {}]   ;;  %s1943_s2 = inlined_call_operand.vmem [shape: f32[1,128], index: 2, kind: input, shape index: {}]   ;;  %s1944_s3 = inlined_call_operand.vmem [shape: bf16[128,256], index: 3, kind: input, shape index: {}]   ;;  %s1945_s4 = inlined_call_operand.vmem [shape: f32[1,256], index: 4, kind: input, shape index: {}]   ;;  %s1946_s5 = inlined_call_operand.vmem [shape: bf16[256,128], index: 5, kind: input, shape index: {}]   ;;  %s1947_s6 = inlined_call_operand.vmem [shape: f32[1,128], index: 6, kind: input, shape index: {}]   ;;  %s1948_s7 = inlined_call_operand.vmem [shape: f32[256,128], index: 7, kind: output, shape index: {}]  }
   0x1 LB: > { %s1209_s25 = sadd.s32 4294967295, %s1505_s24   ;;  %p1213_p0 = scmp.ge.s32.totalorder %s1505_s24, 1  ;;  %s1505_s24 = sphi %s1548_s24, %s17_s24  }
   0x2   : > { %p238_p1 = scmp.lt.s32.totalorder %s1505_s24, 3 }
   0x4   : > { %p239_p2 = pnand %p1213_p0, %p238_p1 }
   0x5   : > { %s1214_s28 = sshll.u32 (!%p239_p2), %s1209_s25, 4 }
   0x6   : > { %242 = sbr.rel (%p239_p2) target bundleno = 1009 (0x3f1), region = 48  ;;  %p271_p3 = scmp.lt.s32.totalorder (!%p239_p2), %s1214_s28, 31 }
   0xb   : > { %v1391_v0 = vld [vmem:[%s1942_s1 + $0x18] sm:$0xff]   ;;  %v1392_v1 = vld [vmem:[%s1942_s1 + $0x10] sm:$0xff]   ;;  %v1393_v2 = vld [vmem:[%s1942_s1 + $0x8] sm:$0xff]   ;;  %s1950_s28 = smov (!%p271_p3, %s1214_s28), 31  ;;  %vm346_vm0 = vcmask 523264   ;;  %v1507_v44 = vmov 0  }
   0xc   : > { %1342 = vmatprep.subr.bf16.mxu0 %v1391_v0  ;;  %v1395_v3 = vld [vmem:[%s1944_s3 + $0x74] ss:$8 sps:$4 sm:$0xff]   ;;  %s1215_s12 = sshll.u32 %s1950_s28, 3  ;;  %v1397_v4 = vld [vmem:[%s1944_s3 + $0x70] ss:$8 sps:$4 sm:$0xff]   ;;  %v1394_v9 = vld [vmem:[%s1942_s1] sm:$0xff]   ;;  %632 = vmatprep.mubr.bf16.mxu1 %v1507_v44 }
   0xd   : > { %1343 = vmatpush3.bf16.msra.mxu0 %v1391_v0  ;;  %s1579_s17 = scalar_lea.vmem %s1941_s0, %s1215_s12  ;;  %600 = vmatprep.subr.bf16.mxu1 %v1395_v3  ;;  %v1398_v5 = vld [vmem:[%s1944_s3 + $0x64] ss:$8 sps:$4 sm:$0xff]   ;;  %v1400_v8 = vld [vmem:[%s1944_s3 + $0x60] ss:$8 sps:$4 sm:$0xff]   ;;  %v1401_v15 = vld [vmem:[%s1944_s3 + $0x54] ss:$8 sps:$4 sm:$0xff]   ;;  %s1904_s30 = scalar_lea.vmem %s1948_s7, %s1215_s12 }
   0xe   : > { %1344 = vmatprep.subr.bf16.mxu0 %v1392_v1  ;;  %v283_v6 = vld [vmem:[%s1579_s17] sm:$0xff]  ;;  %v284_v7 = vld [vmem:[%s1579_s17 + $0x8] sm:$0xff]  ;;  %601 = vmatpush1.bf16.msra.mxu1 %v1397_v4  ;;  %v285_v11 = vld [vmem:[%s1579_s17 + $0x10] sm:$0xff] }
   0xf   : > { %v299_v10 = vpack.c.bf16 %v284_v7, %v283_v6  ;;  %602 = vmatprep.subr.bf16.mxu1 %v1398_v5  ;;  %v286_v12 = vld [vmem:[%s1579_s17 + $0x18] sm:$0xff]  ;;  %v287_v13 = vld [vmem:[%s1579_s17 + $0x20] sm:$0xff]  ;;  %v288_v14 = vld [vmem:[%s1579_s17 + $0x28] sm:$0xff] }
  0x10   : > { %v1403_v16 = vld [vmem:[%s1944_s3 + $0x50] ss:$8 sps:$4 sm:$0xff]   ;;  %v300_v17 = vpack.c.bf16 %v286_v12, %v285_v11  ;;  %v1404_v18 = vld [vmem:[%s1944_s3 + $0x44] ss:$8 sps:$4 sm:$0xff]   ;;  %v301_v19 = vpack.c.bf16 %v288_v14, %v287_v13  ;;  %v1406_v20 = vld [vmem:[%s1944_s3 + $0x40] ss:$8 sps:$4 sm:$0xff]  }
  0x11   : > { %1345 = vmatpush3.bf16.msra.mxu0 %v1392_v1  ;;  %1350 = vmatprep.mubr.msk.bf16.mxu0 %vm346_vm0, %v299_v10  ;;  %v1407_v21 = vld [vmem:[%s1944_s3 + $0x34] ss:$8 sps:$4 sm:$0xff]   ;;  %v1409_v24 = vld [vmem:[%s1944_s3 + $0x30] ss:$8 sps:$4 sm:$0xff]   ;;  %v291_v25 = vld [vmem:[%s1579_s17 + $0x40] sm:$0xff] }
  0x12   : > { %1346 = vmatprep.subr.bf16.mxu0 %v1393_v2  ;;  %603 = vmatpush1.bf16.msra.mxu1 %v1400_v8  ;;  %v289_v22 = vld [vmem:[%s1579_s17 + $0x30] sm:$0xff]  ;;  %v290_v23 = vld [vmem:[%s1579_s17 + $0x38] sm:$0xff]  ;;  %v292_v26 = vld [vmem:[%s1579_s17 + $0x48] sm:$0xff] }
  0x13   : > { %604 = vmatprep.subr.bf16.mxu1 %v1401_v15  ;;  %v302_v27 = vpack.c.bf16 %v290_v23, %v289_v22  ;;  %v303_v28 = vpack.c.bf16 %v292_v26, %v291_v25  ;;  %v293_v29 = vld [vmem:[%s1579_s17 + $0x50] sm:$0xff]  ;;  %v294_v30 = vld [vmem:[%s1579_s17 + $0x58] sm:$0xff]  ;;  %v295_v31 = vld [vmem:[%s1579_s17 + $0x60] sm:$0xff] }
  0x14   : > { %v296_v32 = vld [vmem:[%s1579_s17 + $0x68] sm:$0xff]  ;;  %v304_v33 = vpack.c.bf16 %v294_v30, %v293_v29  ;;  %v297_v35 = vld [vmem:[%s1579_s17 + $0x70] sm:$0xff]  ;;  %v298_v36 = vld [vmem:[%s1579_s17 + $0x78] sm:$0xff] }
  0x15   : > { %1347 = vmatpush3.bf16.msra.mxu0 %v1393_v2  ;;  %v305_v34 = vpack.c.bf16 %v296_v32, %v295_v31  ;;  %v306_v37 = vpack.c.bf16 %v298_v36, %v297_v35  ;;  %v1410_v38 = vld [vmem:[%s1944_s3 + $0x24] ss:$8 sps:$4 sm:$0xff]   ;;  %v1412_v39 = vld [vmem:[%s1944_s3 + $0x20] ss:$8 sps:$4 sm:$0xff]   ;;  %v1413_v40 = vld [vmem:[%s1944_s3 + $0x14] ss:$8 sps:$4 sm:$0xff]  }
  0x16   : > { %1348 = vmatprep.subr.bf16.mxu0 %v1394_v9  ;;  %605 = vmatpush1.bf16.msra.mxu1 %v1403_v16  ;;  %v1415_v41 = vld [vmem:[%s1944_s3 + $0x10] ss:$8 sps:$4 sm:$0xff]   ;;  %v1416_v42 = vld [vmem:[%s1944_s3 + $0x4] ss:$8 sps:$4 sm:$0xff]   ;;  %v1418_v43 = vld [vmem:[%s1944_s3] ss:$8 sps:$4 sm:$0xff]  }
  0x17   : > { %606 = vmatprep.subr.bf16.mxu1 %v1404_v18  ;;  %v1419_v45 = vld [vmem:[%s1946_s5 + $0x78] sm:$0xff]   ;;  %v1421_v47 = vld [vmem:[%s1946_s5 + $0x70] sm:$0xff]   ;;  %v1423_v49 = vld [vmem:[%s1946_s5 + $0x68] sm:$0xff]  }
  0x18   : > { %v1420_v46 = vld [vmem:[%s1946_s5 + $0x38] sm:$0xff]   ;;  %v1422_v48 = vld [vmem:[%s1946_s5 + $0x30] sm:$0xff]   ;;  %v1424_v50 = vld [vmem:[%s1946_s5 + $0x28] sm:$0xff]  }
  0x19   : > { %1349 = vmatpush3.bf16.msra.mxu0 %v1394_v9  ;;  %v1425_v51 = vld [vmem:[%s1946_s5 + $0x60] sm:$0xff]   ;;  %v1427_v53 = vld [vmem:[%s1946_s5 + $0x58] sm:$0xff]  }
  0x1a   : > { %607 = vmatpush1.bf16.msra.mxu1 %v1406_v20  ;;  %1278 = vmatprep.subr.bf16.mxu0 %v1419_v45  ;;  %v1426_v52 = vld [vmem:[%s1946_s5 + $0x20] sm:$0xff]   ;;  %v1428_v54 = vld [vmem:[%s1946_s5 + $0x18] sm:$0xff]  }
  0x1b   : > { %608 = vmatprep.subr.bf16.mxu1 %v1407_v21  ;;  %v1684_v57 = vld [vmem:[%s1943_s2] ss:$0 sm:$0xff] }
  0x1c   : > { %1351 = vmatmul.mubr.msk.bf16.vlgmr.msra.gmra.mxu0 %vm346_vm0, %v300_v17 }
  0x1d   : > { %1354 = vmatprep.mubr.msk.bf16.mxu0 %vm346_vm0, %v301_v19  ;;  %1279 = vmatpush3.bf16.msra.mxu0 %v1420_v46 }
  0x1e   : > { %609 = vmatpush1.bf16.msra.mxu1 %v1409_v24  ;;  %1280 = vmatprep.subr.bf16.mxu0 %v1421_v47 }
  0x1f   : > { %610 = vmatprep.subr.bf16.mxu1 %v1410_v38 }
  0x21   : > { %1281 = vmatpush3.bf16.msra.mxu0 %v1422_v48 }
  0x22   : > { %611 = vmatpush1.bf16.msra.mxu1 %v1412_v39  ;;  %1282 = vmatprep.subr.bf16.mxu0 %v1423_v49 }
  0x23   : > { %612 = vmatprep.subr.bf16.mxu1 %v1413_v40 }
  0x24   : > { %1355 = vmatmul.mubr.msk.bf16.gmra.mxu0 %vm346_vm0, %v302_v27 }
  0x25   : > { %1358 = vmatprep.mubr.msk.bf16.mxu0 %vm346_vm0, %v303_v28  ;;  %1283 = vmatpush3.bf16.msra.mxu0 %v1424_v50 }
  0x26   : > { %613 = vmatpush1.bf16.msra.mxu1 %v1415_v41  ;;  %1284 = vmatprep.subr.bf16.mxu0 %v1425_v51 }
  0x27   : > { %614 = vmatprep.subr.bf16.mxu1 %v1416_v42 }
  0x29   : > { %1285 = vmatpush3.bf16.msra.mxu0 %v1426_v52 }
  0x2a   : > { %615 = vmatpush1.bf16.msra.mxu1 %v1418_v43  ;;  %1286 = vmatprep.subr.bf16.mxu0 %v1427_v53 }
  0x2b   : > { %1366 = vmatprep.subr.bf16.mxu1 %v1419_v45 }
  0x2c   : > { %1359 = vmatmul.mubr.msk.bf16.gmra.mxu0 %vm346_vm0, %v304_v33 }
  0x2d   : > { %1362 = vmatprep.mubr.msk.bf16.mxu0 %vm346_vm0, %v305_v34  ;;  %1287 = vmatpush3.bf16.msra.mxu0 %v1428_v54 }
  0x34   : > { %1363 = vmatmul.mubr.msk.bf16.gmra.mxu0 %vm346_vm0, %v306_v37 }
  0xdc   : > { %v1352_v55 = vpop.f32.mrf.mxu0 }
  0xdd   : > { %v414_v5 = vadd.f32 %v1352_v55, %v1684_v57 }
  0xde   : > { %v405_v56 = vpop.f32.mrf.mxu0 }
  0xdf   : > { %v406_v59 = vadd.f32 %v1684_v57, %v405_v56  ;;  %v470_v8 = vmax.f32 %v414_v5, 0.0 }
  0xe0   : > { %v1353_v58 = vpop.f32.mrf.mxu0 }
  0xe1   : > { %v468_v63 = vmax.f32 %v406_v59, 0.0  ;;  %v417_v2 = vadd.f32 %v1353_v58, %v1684_v57  ;;  %v508_v58 = vld [vmem:[%s1945_s4] sm:$0x3] }
  0xe2   : > { %v408_v60 = vpop.f32.mrf.mxu0 }
  0xe3   : > { %v409_v61 = vadd.f32 %v1684_v57, %v408_v60  ;;  %v471_v6 = vmax.f32 %v417_v2, 0.0 }
  0xe4   : > { %v1356_v62 = vpop.f32.mrf.mxu0 }
  0xe5   : > { %v469_v0 = vmax.f32 %v409_v61, 0.0  ;;  %v485_v9 = vpack.c.bf16 %v471_v6, %v470_v8  ;;  %v430_v16 = vadd.f32 %v1356_v62, %v1684_v57 }
  0xe6   : > { %v421_v1 = vpop.f32.mrf.mxu0 }
  0xe7   : > { %v484_v3 = vpack.c.bf16 %v469_v0, %v468_v63  ;;  %v422_v10 = vadd.f32 %v1684_v57, %v421_v1  ;;  %v474_v20 = vmax.f32 %v430_v16, 0.0 }
  0xe8   : > { %v1357_v4 = vpop.f32.mrf.mxu0 }
  0xe9   : > { %633 = vmatmul.mubr.bf16.vlgmr.msra.gmra.mxu1 %v484_v3  ;;  %v472_v13 = vmax.f32 %v422_v10, 0.0  ;;  %v433_v17 = vadd.f32 %v1357_v4, %v1684_v57 }
  0xea   : > { %642 = vmatprep.mubr.bf16.mxu1 %v1507_v44  ;;  %1374 = vmatpush3.bf16.msra.mxu1 %v1420_v46  ;;  %v424_v7 = vpop.f32.mrf.mxu0 }
  0xeb   : > { %1367 = vmatprep.subr.bf16.mxu1 %v1421_v47  ;;  %v425_v11 = vadd.f32 %v1684_v57, %v424_v7  ;;  %v475_v21 = vmax.f32 %v433_v17, 0.0 }
  0xec   : > { %v1360_v12 = vpop.f32.mrf.mxu0 }
  0xed   : > { %v473_v14 = vmax.f32 %v425_v11, 0.0  ;;  %v487_v23 = vpack.c.bf16 %v475_v21, %v474_v20  ;;  %v446_v30 = vadd.f32 %v1360_v12, %v1684_v57 }
  0xee   : > { %1375 = vmatpush3.bf16.msra.mxu1 %v1422_v48  ;;  %v437_v15 = vpop.f32.mrf.mxu0 }
  0xef   : > { %1368 = vmatprep.subr.bf16.mxu1 %v1423_v49  ;;  %v486_v18 = vpack.c.bf16 %v473_v14, %v472_v13  ;;  %v438_v24 = vadd.f32 %v1684_v57, %v437_v15  ;;  %v478_v34 = vmax.f32 %v446_v30, 0.0  ;;  %v1429_v49 = vld [vmem:[%s1946_s5 + $0x50] sm:$0xff]  }
  0xf0   : > { %v1361_v19 = vpop.f32.mrf.mxu0  ;;  %1288 = vmatprep.subr.bf16.mxu0 %v1429_v49 }
  0xf1   : > { %643 = vmatmul.mubr.bf16.gmra.mxu1 %v485_v9  ;;  %v476_v27 = vmax.f32 %v438_v24, 0.0  ;;  %v449_v31 = vadd.f32 %v1361_v19, %v1684_v57 }
  0xf2   : > { %652 = vmatprep.mubr.bf16.mxu1 %v1507_v44  ;;  %1376 = vmatpush3.bf16.msra.mxu1 %v1424_v50  ;;  %v440_v22 = vpop.f32.mrf.mxu0  ;;  %v1430_v50 = vld [vmem:[%s1946_s5 + $0x10] sm:$0xff]  }
  0xf3   : > { %1369 = vmatprep.subr.bf16.mxu1 %v1425_v51  ;;  %v441_v25 = vadd.f32 %v1684_v57, %v440_v22  ;;  %v479_v35 = vmax.f32 %v449_v31, 0.0  ;;  %1289 = vmatpush3.bf16.msra.mxu0 %v1430_v50  ;;  %v1432_v51 = vld [vmem:[%s1946_s5 + $0x8] sm:$0xff]  }
  0xf4   : > { %v1364_v26 = vpop.f32.mrf.mxu0 }
  0xf5   : > { %v477_v28 = vmax.f32 %v441_v25, 0.0  ;;  %v489_v37 = vpack.c.bf16 %v479_v35, %v478_v34  ;;  %v462_v42 = vadd.f32 %v1364_v26, %v1684_v57 }
  0xf6   : > { %1377 = vmatpush3.bf16.msra.mxu1 %v1426_v52  ;;  %v453_v29 = vpop.f32.mrf.mxu0  ;;  %v1433_v52 = vld [vmem:[%s1946_s5 + $0x40] sm:$0xff]  }
  0xf7   : > { %1370 = vmatprep.subr.bf16.mxu1 %v1427_v53  ;;  %v488_v32 = vpack.c.bf16 %v477_v28, %v476_v27  ;;  %v454_v38 = vadd.f32 %v1684_v57, %v453_v29  ;;  %v482_v46 = vmax.f32 %v462_v42, 0.0  ;;  %v1434_v53 = vld [vmem:[%s1946_s5] sm:$0xff]  }
  0xf8   : > { %v1365_v33 = vpop.f32.mrf.mxu0 }
  0xf9   : > { %653 = vmatmul.mubr.bf16.gmra.mxu1 %v486_v18  ;;  %v480_v40 = vmax.f32 %v454_v38, 0.0  ;;  %v465_v43 = vadd.f32 %v1365_v33, %v1684_v57 }
  0xfa   : > { %662 = vmatprep.mubr.bf16.mxu1 %v1507_v44  ;;  %1378 = vmatpush3.bf16.msra.mxu1 %v1428_v54  ;;  %v456_v36 = vpop.f32.mrf.mxu0  ;;  %v510_v54 = vlaneseq }
  0xfb   : > { %v457_v39 = vadd.f32 %v1684_v57, %v456_v36  ;;  %v483_v47 = vmax.f32 %v465_v43, 0.0  ;;  %1371 = vmatprep.subr.bf16.mxu1 %v1429_v49 }
  0xfc   : > { %v511_v55 = vshrl.u32 %v510_v54, 7 }
  0xfd   : > { %v481_v41 = vmax.f32 %v457_v39, 0.0  ;;  %v491_v48 = vpack.c.bf16 %v483_v47, %v482_v46 }
  0xfe   : > { %1379 = vmatpush3.bf16.msra.mxu1 %v1430_v50  ;;  %v516_v56 = vsub.s32 1, %v511_v55  ;;  %v512_v57 = vsub.s32 0, %v511_v55 }
  0xff   : > { %v490_v45 = vpack.c.bf16 %v481_v41, %v480_v40 }
 0x100   : > { %v1730_v60 = vrot.slane %v508_v58, %v516_v56  ;;  %v1732_v61 = vrot.slane %v508_v58, %v512_v57 }
 0x101   : > { %663 = vmatmul.mubr.bf16.gmra.mxu1 %v487_v23 }
 0x102   : > { %672 = vmatprep.mubr.bf16.mxu1 %v1507_v44 }
 0x109   : > { %673 = vmatmul.mubr.bf16.gmra.mxu1 %v488_v32 }
 0x10a   : > { %682 = vmatprep.mubr.bf16.mxu1 %v1507_v44 }
 0x111   : > { %683 = vmatmul.mubr.bf16.gmra.mxu1 %v489_v37 }
 0x112   : > { %692 = vmatprep.mubr.bf16.mxu1 %v1507_v44 }
 0x119   : > { %693 = vmatmul.mubr.bf16.gmra.mxu1 %v490_v45 }
 0x11a   : > { %702 = vmatprep.mubr.bf16.mxu1 %v1507_v44  ;;  %v1431_v44 = vld [vmem:[%s1946_s5 + $0x48] sm:$0xff]  }
 0x11b   : > { %1290 = vmatprep.subr.bf16.mxu0 %v1431_v44  ;;  %1372 = vmatprep.subr.bf16.mxu1 %v1431_v44 }
 0x11c   : > { %1291 = vmatpush3.bf16.msra.mxu0 %v1432_v51  ;;  %1380 = vmatpush3.bf16.msra.mxu1 %v1432_v51 }
 0x11d   : > { %1292 = vmatprep.subr.bf16.mxu0 %v1433_v52  ;;  %1373 = vmatprep.subr.bf16.mxu1 %v1433_v52 }
 0x120   : > { %1293 = vmatpush3.bf16.msra.mxu0 %v1434_v53  ;;  %1381 = vmatpush3.bf16.msra.mxu1 %v1434_v53 }
 0x121   : > { %703 = vmatmul.mubr.bf16.gmra.mxu1 %v491_v48 }
 0x1a9   : > { %v634_v59 = vpop.f32.mrf.mxu1 }
 0x1aa   : > { %v635_v2 = vadd.f32 %v634_v59, %v1732_v61 }
 0x1ab   : > { %v636_v62 = vpop.f32.mrf.mxu1 }
 0x1ac   : > { %v637_v0 = vadd.f32 %v636_v62, %v1730_v60  ;;  %v713_v9 = vmax.f32 %v635_v2, 0.0 }
 0x1ad   : > { %v638_v63 = vpop.f32.mrf.mxu1 }
 0x1ae   : > { %v639_v1 = vadd.f32 %v638_v63, %v1732_v61  ;;  %v714_v7 = vmax.f32 %v637_v0, 0.0 }
 0x1af   : > { %v640_v3 = vpop.f32.mrf.mxu1 }
 0x1b0   : > { %v641_v4 = vadd.f32 %v640_v3, %v1730_v60  ;;  %v715_v5 = vmax.f32 %v639_v1, 0.0 }
 0x1b1   : > { %v644_v6 = vpop.f32.mrf.mxu1 }
 0x1b2   : > { %v716_v8 = vmax.f32 %v641_v4, 0.0  ;;  %v745_v12 = vpack.c.bf16 %v715_v5, %v713_v9  ;;  %v645_v16 = vadd.f32 %v644_v6, %v1732_v61 }
 0x1b3   : > { %v646_v10 = vpop.f32.mrf.mxu1 }
 0x1b4   : > { %v746_v11 = vpack.c.bf16 %v716_v8, %v714_v7  ;;  %v647_v14 = vadd.f32 %v646_v10, %v1730_v60  ;;  %v717_v23 = vmax.f32 %v645_v16, 0.0 }
 0x1b5   : > { %v648_v13 = vpop.f32.mrf.mxu1 }
 0x1b6   : > { %v649_v15 = vadd.f32 %v648_v13, %v1732_v61  ;;  %928 = vmatprep.mubr.bf16.mxu0 %v746_v11  ;;  %v718_v21 = vmax.f32 %v647_v14, 0.0 }
 0x1b7   : > { %v650_v17 = vpop.f32.mrf.mxu1  ;;  %929 = vmatmul.mubr.bf16.vlgmr.msra.gmra.mxu0 %v745_v12 }
 0x1b8   : > { %v651_v18 = vadd.f32 %v650_v17, %v1730_v60  ;;  %v719_v19 = vmax.f32 %v649_v15, 0.0 }
 0x1b9   : > { %v654_v20 = vpop.f32.mrf.mxu1 }
 0x1ba   : > { %v720_v22 = vmax.f32 %v651_v18, 0.0  ;;  %v747_v26 = vpack.c.bf16 %v719_v19, %v717_v23  ;;  %v655_v30 = vadd.f32 %v654_v20, %v1732_v61 }
 0x1bb   : > { %v656_v24 = vpop.f32.mrf.mxu1 }
 0x1bc   : > { %v748_v25 = vpack.c.bf16 %v720_v22, %v718_v21  ;;  %v657_v28 = vadd.f32 %v656_v24, %v1730_v60  ;;  %v721_v37 = vmax.f32 %v655_v30, 0.0 }
 0x1bd   : > { %v658_v27 = vpop.f32.mrf.mxu1 }
 0x1be   : > { %v659_v29 = vadd.f32 %v658_v27, %v1732_v61  ;;  %936 = vmatprep.mubr.bf16.mxu0 %v748_v25  ;;  %v722_v35 = vmax.f32 %v657_v28, 0.0 }
 0x1bf   : > { %v660_v31 = vpop.f32.mrf.mxu1  ;;  %937 = vmatmul.mubr.bf16.gmra.mxu0 %v747_v26 }
 0x1c0   : > { %v661_v32 = vadd.f32 %v660_v31, %v1730_v60  ;;  %v723_v33 = vmax.f32 %v659_v29, 0.0 }
 0x1c1   : > { %v664_v34 = vpop.f32.mrf.mxu1 }
 0x1c2   : > { %v724_v36 = vmax.f32 %v661_v32, 0.0  ;;  %v749_v40 = vpack.c.bf16 %v723_v33, %v721_v37  ;;  %v665_v45 = vadd.f32 %v664_v34, %v1732_v61 }
 0x1c3   : > { %v666_v38 = vpop.f32.mrf.mxu1 }
 0x1c4   : > { %v750_v39 = vpack.c.bf16 %v724_v36, %v722_v35  ;;  %v667_v42 = vadd.f32 %v666_v38, %v1730_v60  ;;  %v725_v51 = vmax.f32 %v665_v45, 0.0 }
 0x1c5   : > { %v668_v41 = vpop.f32.mrf.mxu1 }
 0x1c6   : > { %v669_v43 = vadd.f32 %v668_v41, %v1732_v61  ;;  %944 = vmatprep.mubr.bf16.mxu0 %v750_v39  ;;  %v726_v50 = vmax.f32 %v667_v42, 0.0 }
 0x1c7   : > { %v670_v46 = vpop.f32.mrf.mxu1  ;;  %945 = vmatmul.mubr.bf16.gmra.mxu0 %v749_v40 }
 0x1c8   : > { %v671_v47 = vadd.f32 %v670_v46, %v1730_v60  ;;  %v727_v48 = vmax.f32 %v669_v43, 0.0 }
 0x1c9   : > { %v674_v49 = vpop.f32.mrf.mxu1 }
 0x1ca   : > { %v728_v44 = vmax.f32 %v671_v47, 0.0  ;;  %v751_v54 = vpack.c.bf16 %v727_v48, %v725_v51  ;;  %v675_v58 = vadd.f32 %v674_v49, %v1732_v61 }
 0x1cb   : > { %v676_v52 = vpop.f32.mrf.mxu1 }
 0x1cc   : > { %v752_v53 = vpack.c.bf16 %v728_v44, %v726_v50  ;;  %v677_v56 = vadd.f32 %v676_v52, %v1730_v60  ;;  %v729_v3 = vmax.f32 %v675_v58, 0.0  ;;  %v1769_v50 = vld [vmem:[%s1947_s6] ss:$0 sm:$0xff] }
 0x1cd   : > { %v678_v55 = vpop.f32.mrf.mxu1 }
 0x1ce   : > { %v679_v57 = vadd.f32 %v678_v55, %v1732_v61  ;;  %952 = vmatprep.mubr.bf16.mxu0 %v752_v53  ;;  %v730_v1 = vmax.f32 %v677_v56, 0.0 }
 0x1cf   : > { %v680_v59 = vpop.f32.mrf.mxu1  ;;  %953 = vmatmul.mubr.bf16.gmra.mxu0 %v751_v54 }
 0x1d0   : > { %v681_v62 = vadd.f32 %v680_v59, %v1730_v60  ;;  %v731_v63 = vmax.f32 %v679_v57, 0.0 }
 0x1d1   : > { %v684_v0 = vpop.f32.mrf.mxu1 }
 0x1d2   : > { %v732_v2 = vmax.f32 %v681_v62, 0.0  ;;  %v753_v6 = vpack.c.bf16 %v731_v63, %v729_v3  ;;  %v685_v10 = vadd.f32 %v684_v0, %v1732_v61 }
 0x1d3   : > { %v686_v4 = vpop.f32.mrf.mxu1 }
 0x1d4   : > { %v754_v5 = vpack.c.bf16 %v732_v2, %v730_v1  ;;  %v687_v8 = vadd.f32 %v686_v4, %v1730_v60  ;;  %v733_v17 = vmax.f32 %v685_v10, 0.0 }
 0x1d5   : > { %v688_v7 = vpop.f32.mrf.mxu1 }
 0x1d6   : > { %v689_v9 = vadd.f32 %v688_v7, %v1732_v61  ;;  %960 = vmatprep.mubr.bf16.mxu0 %v754_v5  ;;  %v734_v15 = vmax.f32 %v687_v8, 0.0 }
 0x1d7   : > { %v690_v11 = vpop.f32.mrf.mxu1  ;;  %961 = vmatmul.mubr.bf16.gmra.mxu0 %v753_v6 }
 0x1d8   : > { %v691_v12 = vadd.f32 %v690_v11, %v1730_v60  ;;  %v735_v13 = vmax.f32 %v689_v9, 0.0 }
 0x1d9   : > { %v694_v14 = vpop.f32.mrf.mxu1 }
 0x1da   : > { %v736_v16 = vmax.f32 %v691_v12, 0.0  ;;  %v755_v20 = vpack.c.bf16 %v735_v13, %v733_v17  ;;  %v695_v24 = vadd.f32 %v694_v14, %v1732_v61 }
 0x1db   : > { %v696_v18 = vpop.f32.mrf.mxu1 }
 0x1dc   : > { %v756_v19 = vpack.c.bf16 %v736_v16, %v734_v15  ;;  %v697_v22 = vadd.f32 %v696_v18, %v1730_v60  ;;  %v737_v31 = vmax.f32 %v695_v24, 0.0 }
 0x1dd   : > { %v698_v21 = vpop.f32.mrf.mxu1 }
 0x1de   : > { %v699_v23 = vadd.f32 %v698_v21, %v1732_v61  ;;  %968 = vmatprep.mubr.bf16.mxu0 %v756_v19  ;;  %v738_v29 = vmax.f32 %v697_v22, 0.0 }
 0x1df   : > { %v700_v25 = vpop.f32.mrf.mxu1  ;;  %969 = vmatmul.mubr.bf16.gmra.mxu0 %v755_v20 }
 0x1e0   : > { %v701_v26 = vadd.f32 %v700_v25, %v1730_v60  ;;  %v739_v27 = vmax.f32 %v699_v23, 0.0 }
 0x1e1   : > { %v704_v28 = vpop.f32.mrf.mxu1 }
 0x1e2   : > { %v740_v30 = vmax.f32 %v701_v26, 0.0  ;;  %v757_v34 = vpack.c.bf16 %v739_v27, %v737_v31  ;;  %v705_v38 = vadd.f32 %v704_v28, %v1732_v61 }
 0x1e3   : > { %v706_v32 = vpop.f32.mrf.mxu1 }
 0x1e4   : > { %v758_v33 = vpack.c.bf16 %v740_v30, %v738_v29  ;;  %v707_v36 = vadd.f32 %v706_v32, %v1730_v60  ;;  %v741_v45 = vmax.f32 %v705_v38, 0.0 }
 0x1e5   : > { %v708_v35 = vpop.f32.mrf.mxu1 }
 0x1e6   : > { %v709_v37 = vadd.f32 %v708_v35, %v1732_v61  ;;  %976 = vmatprep.mubr.bf16.mxu0 %v758_v33  ;;  %v742_v42 = vmax.f32 %v707_v36, 0.0 }
 0x1e7   : > { %v710_v39 = vpop.f32.mrf.mxu1  ;;  %977 = vmatmul.mubr.bf16.gmra.mxu0 %v757_v34 }
 0x1e8   : > { %v711_v40 = vadd.f32 %v710_v39, %v1730_v60  ;;  %v743_v41 = vmax.f32 %v709_v37, 0.0 }
 0x1ea   : > { %v744_v43 = vmax.f32 %v711_v40, 0.0  ;;  %v759_v47 = vpack.c.bf16 %v743_v41, %v741_v45 }
 0x1ec   : > { %v760_v46 = vpack.c.bf16 %v744_v43, %v742_v42 }
 0x1ee   : > { %984 = vmatprep.mubr.bf16.mxu1 %v760_v46 }
 0x1ef   : > { %985 = vmatmul.mubr.bf16.vlgmr.msra.gmra.mxu1 %v759_v47 }
 0x277   : > { %v1294_v48 = vpop.f32.mrf.mxu0 }
 0x279   : > { %v1295_v49 = vpop.f32.mrf.mxu0 }
 0x27a   : > { %v1296_v61 = vadd.f32 %v1295_v49, %v1294_v48 }
 0x27b   : > { %v1297_v44 = vpop.f32.mrf.mxu0 }
 0x27c   : > { %v1772_v51 = vadd.f32 %v1296_v61, %v1769_v50 }
 0x27d   : > { %v1298_v60 = vpop.f32.mrf.mxu0 }
 0x27e   : > { %v1299_v52 = vadd.f32 %v1298_v60, %v1297_v44  ;;  %993 = vmax.xlane.f32.xlu0 %v1772_v51 }
 0x27f   : > { %v1300_v53 = vpop.f32.mrf.mxu0 }
 0x280   : > { %v1776_v54 = vadd.f32 %v1299_v52, %v1769_v50 }
 0x281   : > { %v1301_v55 = vpop.f32.mrf.mxu0 }
 0x282   : > { %v1302_v56 = vadd.f32 %v1301_v55, %v1300_v53  ;;  %995 = vmax.xlane.f32.xlu0 %v1776_v54 }
 0x283   : > { %v1303_v57 = vpop.f32.mrf.mxu0 }
 0x284   : > { %v1780_v58 = vadd.f32 %v1302_v56, %v1769_v50 }
 0x285   : > { %v1304_v59 = vpop.f32.mrf.mxu0 }
 0x286   : > { %v1305_v62 = vadd.f32 %v1304_v59, %v1303_v57  ;;  %997 = vmax.xlane.f32.xlu1 %v1780_v58 }
 0x287   : > { %v1306_v63 = vpop.f32.mrf.mxu0 }
 0x288   : > { %v1784_v0 = vadd.f32 %v1305_v62, %v1769_v50 }
 0x289   : > { %v1307_v1 = vpop.f32.mrf.mxu0 }
 0x28a   : > { %v1308_v2 = vadd.f32 %v1307_v1, %v1306_v63  ;;  %999 = vmax.xlane.f32.xlu1 %v1784_v0 }
 0x28b   : > { %v1309_v3 = vpop.f32.mrf.mxu0 }
 0x28c   : > { %v1788_v4 = vadd.f32 %v1308_v2, %v1769_v50 }
 0x28d   : > { %v1310_v5 = vpop.f32.mrf.mxu0 }
 0x28e   : > { %v1311_v6 = vadd.f32 %v1310_v5, %v1309_v3  ;;  %1001 = vmax.xlane.f32.xlu0 %v1788_v4 }
 0x28f   : > { %v1312_v7 = vpop.f32.mrf.mxu0 }
 0x290   : > { %v1792_v8 = vadd.f32 %v1311_v6, %v1769_v50 }
 0x291   : > { %v1313_v9 = vpop.f32.mrf.mxu0 }
 0x292   : > { %v1314_v10 = vadd.f32 %v1313_v9, %v1312_v7  ;;  %1003 = vmax.xlane.f32.xlu1 %v1792_v8 }
 0x293   : > { %v1315_v11 = vpop.f32.mrf.mxu0 }
 0x294   : > { %v1796_v12 = vadd.f32 %v1314_v10, %v1769_v50 }
 0x295   : > { %v1316_v13 = vpop.f32.mrf.mxu0 }
 0x296   : > { %v1317_v14 = vadd.f32 %v1316_v13, %v1315_v11  ;;  %1005 = vmax.xlane.f32.xlu0 %v1796_v12 }
 0x297   : > { %v1318_v15 = vpop.f32.mrf.mxu0 }
 0x298   : > { %v1800_v16 = vadd.f32 %v1317_v14, %v1769_v50 }
 0x299   : > { %v1319_v17 = vpop.f32.mrf.mxu0 }
 0x29a   : > { %v1320_v18 = vadd.f32 %v1319_v17, %v1318_v15  ;;  %1007 = vmax.xlane.f32.xlu1 %v1800_v16 }
 0x29b   : > { %v1321_v19 = vpop.f32.mrf.mxu0 }
 0x29c   : > { %v1804_v20 = vadd.f32 %v1320_v18, %v1769_v50 }
 0x29d   : > { %v1322_v21 = vpop.f32.mrf.mxu0 }
 0x29e   : > { %v1323_v22 = vadd.f32 %v1322_v21, %v1321_v19  ;;  %1009 = vmax.xlane.f32.xlu0 %v1804_v20 }
 0x29f   : > { %v1324_v23 = vpop.f32.mrf.mxu0 }
 0x2a0   : > { %v1808_v24 = vadd.f32 %v1323_v22, %v1769_v50 }
 0x2a1   : > { %v1325_v25 = vpop.f32.mrf.mxu0 }
 0x2a2   : > { %v1326_v26 = vadd.f32 %v1325_v25, %v1324_v23  ;;  %1011 = vmax.xlane.f32.xlu1 %v1808_v24 }
 0x2a3   : > { %v1327_v27 = vpop.f32.mrf.mxu0 }
 0x2a4   : > { %v1812_v28 = vadd.f32 %v1326_v26, %v1769_v50 }
 0x2a5   : > { %v1328_v29 = vpop.f32.mrf.mxu0 }
 0x2a6   : > { %v1329_v30 = vadd.f32 %v1328_v29, %v1327_v27  ;;  %1013 = vmax.xlane.f32.xlu0 %v1812_v28 }
 0x2a7   : > { %v1330_v31 = vpop.f32.mrf.mxu0 }
 0x2a8   : > { %v1816_v32 = vadd.f32 %v1329_v30, %v1769_v50 }
 0x2a9   : > { %v1331_v33 = vpop.f32.mrf.mxu0 }
 0x2aa   : > { %v1332_v34 = vadd.f32 %v1331_v33, %v1330_v31  ;;  %1015 = vmax.xlane.f32.xlu1 %v1816_v32 }
 0x2ab   : > { %v1333_v35 = vpop.f32.mrf.mxu0 }
 0x2ac   : > { %v1820_v36 = vadd.f32 %v1332_v34, %v1769_v50 }
 0x2ad   : > { %v1334_v37 = vpop.f32.mrf.mxu0 }
 0x2ae   : > { %v1335_v38 = vadd.f32 %v1334_v37, %v1333_v35  ;;  %1017 = vmax.xlane.f32.xlu0 %v1820_v36 }
 0x2af   : > { %v1336_v39 = vpop.f32.mrf.mxu1 }
 0x2b0   : > { %v1824_v40 = vadd.f32 %v1335_v38, %v1769_v50 }
 0x2b1   : > { %v1337_v41 = vpop.f32.mrf.mxu1 }
 0x2b2   : > { %v1338_v42 = vadd.f32 %v1337_v41, %v1336_v39  ;;  %1019 = vmax.xlane.f32.xlu1 %v1824_v40 }
 0x2b3   : > { %v1339_v43 = vpop.f32.mrf.mxu1 }
 0x2b4   : > { %v1828_v45 = vadd.f32 %v1338_v42, %v1769_v50 }
 0x2b5   : > { %v1340_v46 = vpop.f32.mrf.mxu1 }
 0x2b6   : > { %v1341_v47 = vadd.f32 %v1340_v46, %v1339_v43  ;;  %1021 = vmax.xlane.f32.xlu0 %v1828_v45 }
 0x2b8   : > { %v1832_v48 = vadd.f32 %v1341_v47, %v1769_v50 }
 0x2ba   : > { %1023 = vmax.xlane.f32.xlu1 %v1832_v48 }
 0x307   : > { %v994_v49 = vpop.xlane.xlu0 %993 }
 0x308   : > { %v1025_v61 = vsub.f32 %v1772_v51, %v994_v49 }
 0x30a   : > { %v1041_v44 = vmul.f32 1.442695, %v1025_v61 }
 0x30b   : > { %v996_v60 = vpop.xlane.xlu0 %995 }
 0x30c   : > { %1435 = vpow2.f32 %v1041_v44  ;;  %v1026_v52 = vsub.f32 %v1776_v54, %v996_v60 }
 0x30e   : > { %v1043_v53 = vmul.f32 1.442695, %v1026_v52 }
 0x30f   : > { %v998_v55 = vpop.xlane.xlu1 %997 }
 0x310   : > { %1437 = vpow2.f32 %v1043_v53  ;;  %v1027_v56 = vsub.f32 %v1780_v58, %v998_v55 }
 0x312   : > { %v1045_v57 = vmul.f32 1.442695, %v1027_v56 }
 0x313   : > { %v1000_v59 = vpop.xlane.xlu1 %999 }
 0x314   : > { %1439 = vpow2.f32 %v1045_v57  ;;  %v1028_v50 = vsub.f32 %v1784_v0, %v1000_v59 }
 0x316   : > { %v1047_v62 = vmul.f32 1.442695, %v1028_v50 }
 0x317   : > { %v1002_v63 = vpop.xlane.xlu0 %1001 }
 0x318   : > { %1441 = vpow2.f32 %v1047_v62  ;;  %v1029_v51 = vsub.f32 %v1788_v4, %v1002_v63 }
 0x319   : > { %v1840_v1 = vpop.eup %1435 }
 0x31a   : > { %v1049_v2 = vmul.f32 1.442695, %v1029_v51  ;;  %1073 = vadd.xlane.f32.xlu0 %v1840_v1 }
 0x31b   : > { %v1004_v54 = vpop.xlane.xlu1 %1003 }
 0x31c   : > { %1443 = vpow2.f32 %v1049_v2  ;;  %v1030_v3 = vsub.f32 %v1792_v8, %v1004_v54 }
 0x31d   : > { %v1844_v58 = vpop.eup %1437 }
 0x31e   : > { %v1051_v5 = vmul.f32 1.442695, %v1030_v3  ;;  %1075 = vadd.xlane.f32.xlu1 %v1844_v58 }
 0x31f   : > { %v1006_v0 = vpop.xlane.xlu0 %1005 }
 0x320   : > { %1445 = vpow2.f32 %v1051_v5  ;;  %v1031_v6 = vsub.f32 %v1796_v12, %v1006_v0 }
 0x321   : > { %v1848_v7 = vpop.eup %1439 }
 0x322   : > { %v1053_v4 = vmul.f32 1.442695, %v1031_v6  ;;  %1077 = vadd.xlane.f32.xlu0 %v1848_v7 }
 0x323   : > { %v1008_v9 = vpop.xlane.xlu1 %1007 }
 0x324   : > { %1447 = vpow2.f32 %v1053_v4  ;;  %v1032_v10 = vsub.f32 %v1800_v16, %v1008_v9 }
 0x325   : > { %v1852_v11 = vpop.eup %1441 }
 0x326   : > { %v1055_v8 = vmul.f32 1.442695, %v1032_v10  ;;  %1079 = vadd.xlane.f32.xlu1 %v1852_v11 }
 0x327   : > { %v1010_v13 = vpop.xlane.xlu0 %1009 }
 0x328   : > { %1449 = vpow2.f32 %v1055_v8  ;;  %v1033_v14 = vsub.f32 %v1804_v20, %v1010_v13 }
 0x329   : > { %v1856_v15 = vpop.eup %1443 }
 0x32a   : > { %v1057_v12 = vmul.f32 1.442695, %v1033_v14  ;;  %1081 = vadd.xlane.f32.xlu0 %v1856_v15 }
 0x32b   : > { %v1012_v17 = vpop.xlane.xlu1 %1011 }
 0x32c   : > { %1451 = vpow2.f32 %v1057_v12  ;;  %v1034_v18 = vsub.f32 %v1808_v24, %v1012_v17 }
 0x32d   : > { %v1860_v19 = vpop.eup %1445 }
 0x32e   : > { %v1059_v16 = vmul.f32 1.442695, %v1034_v18  ;;  %1083 = vadd.xlane.f32.xlu1 %v1860_v19 }
 0x32f   : > { %v1014_v21 = vpop.xlane.xlu0 %1013 }
 0x330   : > { %1453 = vpow2.f32 %v1059_v16  ;;  %v1035_v22 = vsub.f32 %v1812_v28, %v1014_v21 }
 0x331   : > { %v1864_v23 = vpop.eup %1447 }
 0x332   : > { %v1061_v20 = vmul.f32 1.442695, %v1035_v22  ;;  %1085 = vadd.xlane.f32.xlu0 %v1864_v23 }
 0x333   : > { %v1016_v25 = vpop.xlane.xlu1 %1015 }
 0x334   : > { %1455 = vpow2.f32 %v1061_v20  ;;  %v1036_v26 = vsub.f32 %v1816_v32, %v1016_v25 }
 0x335   : > { %v1868_v27 = vpop.eup %1449 }
 0x336   : > { %v1063_v24 = vmul.f32 1.442695, %v1036_v26  ;;  %1087 = vadd.xlane.f32.xlu1 %v1868_v27 }
 0x337   : > { %v1018_v29 = vpop.xlane.xlu0 %1017 }
 0x338   : > { %1457 = vpow2.f32 %v1063_v24  ;;  %v1037_v30 = vsub.f32 %v1820_v36, %v1018_v29 }
 0x339   : > { %v1872_v31 = vpop.eup %1451 }
 0x33a   : > { %v1065_v28 = vmul.f32 1.442695, %v1037_v30  ;;  %1089 = vadd.xlane.f32.xlu0 %v1872_v31 }
 0x33b   : > { %v1020_v33 = vpop.xlane.xlu1 %1019 }
 0x33c   : > { %1459 = vpow2.f32 %v1065_v28  ;;  %v1038_v34 = vsub.f32 %v1824_v40, %v1020_v33 }
 0x33d   : > { %v1876_v35 = vpop.eup %1453 }
 0x33e   : > { %v1067_v32 = vmul.f32 1.442695, %v1038_v34  ;;  %1091 = vadd.xlane.f32.xlu1 %v1876_v35 }
 0x33f   : > { %v1022_v37 = vpop.xlane.xlu0 %1021 }
 0x340   : > { %1461 = vpow2.f32 %v1067_v32  ;;  %v1039_v38 = vsub.f32 %v1828_v45, %v1022_v37 }
 0x341   : > { %v1880_v39 = vpop.eup %1455 }
 0x342   : > { %v1069_v36 = vmul.f32 1.442695, %v1039_v38  ;;  %1093 = vadd.xlane.f32.xlu0 %v1880_v39 }
 0x343   : > { %v1024_v41 = vpop.xlane.xlu1 %1023 }
 0x344   : > { %1463 = vpow2.f32 %v1069_v36  ;;  %v1040_v42 = vsub.f32 %v1832_v48, %v1024_v41 }
 0x345   : > { %v1884_v43 = vpop.eup %1457 }
 0x346   : > { %v1071_v40 = vmul.f32 1.442695, %v1040_v42  ;;  %1095 = vadd.xlane.f32.xlu1 %v1884_v43 }
 0x348   : > { %1465 = vpow2.f32 %v1071_v40 }
 0x349   : > { %v1887_v46 = vpop.eup %1459 }
 0x34a   : > { %1097 = vadd.xlane.f32.xlu0 %v1887_v46 }
 0x34d   : > { %v1890_v45 = vpop.eup %1461 }
 0x34e   : > { %1099 = vadd.xlane.f32.xlu1 %v1890_v45 }
 0x351   : > { %v1893_v47 = vpop.eup %1463 }
 0x352   : > { %1101 = vadd.xlane.f32.xlu0 %v1893_v47 }
 0x355   : > { %v1896_v48 = vpop.eup %1465 }
 0x356   : > { %1103 = vadd.xlane.f32.xlu1 %v1896_v48 }
 0x3a3   : > { %v1074_v49 = vpop.xlane.xlu0 %1073 }
 0x3a4   : > { %1467 = vrcp.f32 %v1074_v49 }
 0x3a7   : > { %v1076_v61 = vpop.xlane.xlu1 %1075 }
 0x3a8   : > { %1469 = vrcp.f32 %v1076_v61 }
 0x3ab   : > { %v1078_v44 = vpop.xlane.xlu0 %1077 }
 0x3ac   : > { %1471 = vrcp.f32 %v1078_v44 }
 0x3af   : > { %v1080_v60 = vpop.xlane.xlu1 %1079 }
 0x3b0   : > { %1473 = vrcp.f32 %v1080_v60 }
 0x3b1   : > { %v1468_v52 = vpop.eup %1467 }
 0x3b2   : > { %v1121_v53 = vmul.f32 %v1468_v52, %v1840_v1 }
 0x3b3   : > { %v1082_v55 = vpop.xlane.xlu0 %1081 }
 0x3b4   : > { %1137 = vst [vmem:[%s1904_s30] sm:$0xff] %v1121_v53  ;;  %1475 = vrcp.f32 %v1082_v55 }
 0x3b5   : > { %v1470_v56 = vpop.eup %1469 }
 0x3b6   : > { %v1122_v57 = vmul.f32 %v1470_v56, %v1844_v58 }
 0x3b7   : > { %v1084_v59 = vpop.xlane.xlu1 %1083 }
 0x3b8   : > { %1138 = vst [vmem:[%s1904_s30 + $0x8] sm:$0xff] %v1122_v57  ;;  %1477 = vrcp.f32 %v1084_v59 }
 0x3b9   : > { %v1472_v50 = vpop.eup %1471 }
 0x3ba   : > { %v1123_v62 = vmul.f32 %v1472_v50, %v1848_v7 }
 0x3bb   : > { %v1086_v63 = vpop.xlane.xlu0 %1085 }
 0x3bc   : > { %1139 = vst [vmem:[%s1904_s30 + $0x10] sm:$0xff] %v1123_v62  ;;  %1479 = vrcp.f32 %v1086_v63 }
 0x3bd   : > { %v1474_v51 = vpop.eup %1473 }
 0x3be   : > { %v1124_v1 = vmul.f32 %v1474_v51, %v1852_v11 }
 0x3bf   : > { %v1088_v2 = vpop.xlane.xlu1 %1087 }
 0x3c0   : > { %1140 = vst [vmem:[%s1904_s30 + $0x18] sm:$0xff] %v1124_v1  ;;  %1481 = vrcp.f32 %v1088_v2 }
 0x3c1   : > { %v1476_v54 = vpop.eup %1475 }
 0x3c2   : > { %v1125_v3 = vmul.f32 %v1476_v54, %v1856_v15 }
 0x3c3   : > { %v1090_v58 = vpop.xlane.xlu0 %1089 }
 0x3c4   : > { %1141 = vst [vmem:[%s1904_s30 + $0x20] sm:$0xff] %v1125_v3  ;;  %1483 = vrcp.f32 %v1090_v58 }
 0x3c5   : > { %v1478_v5 = vpop.eup %1477 }
 0x3c6   : > { %v1126_v0 = vmul.f32 %v1478_v5, %v1860_v19 }
 0x3c7   : > { %v1092_v6 = vpop.xlane.xlu1 %1091 }
 0x3c8   : > { %1142 = vst [vmem:[%s1904_s30 + $0x28] sm:$0xff] %v1126_v0  ;;  %1485 = vrcp.f32 %v1092_v6 }
 0x3c9   : > { %v1480_v7 = vpop.eup %1479 }
 0x3ca   : > { %v1127_v4 = vmul.f32 %v1480_v7, %v1864_v23 }
 0x3cb   : > { %v1094_v9 = vpop.xlane.xlu0 %1093 }
 0x3cc   : > { %1143 = vst [vmem:[%s1904_s30 + $0x30] sm:$0xff] %v1127_v4  ;;  %1487 = vrcp.f32 %v1094_v9 }
 0x3cd   : > { %v1482_v10 = vpop.eup %1481 }
 0x3ce   : > { %v1128_v11 = vmul.f32 %v1482_v10, %v1868_v27 }
 0x3cf   : > { %v1096_v8 = vpop.xlane.xlu1 %1095 }
 0x3d0   : > { %1144 = vst [vmem:[%s1904_s30 + $0x38] sm:$0xff] %v1128_v11  ;;  %1489 = vrcp.f32 %v1096_v8 }
 0x3d1   : > { %v1484_v13 = vpop.eup %1483 }
 0x3d2   : > { %v1129_v14 = vmul.f32 %v1484_v13, %v1872_v31 }
 0x3d3   : > { %v1098_v15 = vpop.xlane.xlu0 %1097 }
 0x3d4   : > { %1145 = vst [vmem:[%s1904_s30 + $0x40] sm:$0xff] %v1129_v14  ;;  %1491 = vrcp.f32 %v1098_v15 }
 0x3d5   : > { %v1486_v12 = vpop.eup %1485 }
 0x3d6   : > { %v1130_v17 = vmul.f32 %v1486_v12, %v1876_v35 }
 0x3d7   : > { %v1100_v18 = vpop.xlane.xlu1 %1099 }
 0x3d8   : > { %1146 = vst [vmem:[%s1904_s30 + $0x48] sm:$0xff] %v1130_v17  ;;  %1493 = vrcp.f32 %v1100_v18 }
 0x3d9   : > { %v1488_v19 = vpop.eup %1487 }
 0x3da   : > { %v1131_v16 = vmul.f32 %v1488_v19, %v1880_v39 }
 0x3db   : > { %v1102_v21 = vpop.xlane.xlu0 %1101 }
 0x3dc   : > { %1147 = vst [vmem:[%s1904_s30 + $0x50] sm:$0xff] %v1131_v16  ;;  %1495 = vrcp.f32 %v1102_v21 }
 0x3dd   : > { %v1490_v22 = vpop.eup %1489 }
 0x3de   : > { %v1132_v23 = vmul.f32 %v1490_v22, %v1884_v43 }
 0x3df   : > { %v1104_v20 = vpop.xlane.xlu1 %1103 }
 0x3e0   : > { %1148 = vst [vmem:[%s1904_s30 + $0x58] sm:$0xff] %v1132_v23  ;;  %1497 = vrcp.f32 %v1104_v20 }
 0x3e1   : > { %v1492_v25 = vpop.eup %1491 }
 0x3e2   : > { %v1133_v26 = vmul.f32 %v1492_v25, %v1887_v46 }
 0x3e4   : > { %1149 = vst [vmem:[%s1904_s30 + $0x60] sm:$0xff] %v1133_v26 }
 0x3e5   : > { %v1494_v27 = vpop.eup %1493 }
 0x3e6   : > { %v1134_v24 = vmul.f32 %v1494_v27, %v1890_v45 }
 0x3e8   : > { %1150 = vst [vmem:[%s1904_s30 + $0x68] sm:$0xff] %v1134_v24 }
 0x3e9   : > { %v1496_v29 = vpop.eup %1495 }
 0x3ea   : > { %v1135_v30 = vmul.f32 %v1496_v29, %v1893_v47 }
 0x3ec   : > { %1151 = vst [vmem:[%s1904_s30 + $0x70] sm:$0xff] %v1135_v30 }
 0x3ed   : > { %v1498_v31 = vpop.eup %1497 }
 0x3ee   : > { %v1136_v28 = vmul.f32 %v1498_v31, %v1896_v48 }
 0x3f0   : > { %1152 = vst [vmem:[%s1904_s30 + $0x78] sm:$0xff] %v1136_v28 }
 0x3f1 PF: > { %s17_s24 = sadd.s32 1, %s1505_s24  }
 0x3f2   : > { %p14_p4 = scmp.ge.s32.totalorder %s17_s24, 4  }
 0x3f4   :  { %16 = sbr.rel (!%p14_p4) target bundleno = 1 (0x1), region = 78 }

</bundles_post_ra>
